<compile_context>
chip_gen: v6e
topology: v6e:2x2x1
jax: 0.10.0
libtpu: 0.0.40
codegen_flags: <defaults>
</compile_context>

<pallas_src>
import functools

import jax
import jax.numpy as jnp
from jax.experimental import pallas as pl
from jax.experimental.pallas import tpu as pltpu


def _round_up(n, m):
    return ((n + m - 1) // m) * m


def _vmem_budget_bytes():
    # Per-generation VMEM budget (85% of physical, leaving compiler headroom).
    try:
        cap = int(pltpu.get_tpu_info().vmem_capacity_bytes)
    except Exception:
        cap = 64 << 20  # conservative fallback (v7x per-TC size)
    return max(32 << 20, int(0.85 * cap))


def rbf_kan_kernel(x_ref, ct_ref, csq1_ref, w_ref, o_ref, basis_ref, *, alpha_sq):
    # x_ref:    (tm, Dp)  input batch tile (native dtype)
    # ct_ref:   (Dp, Cp)  -2*alpha^2 * centers^T   (constant, single-buffered)
    # csq1_ref: (1,  Cp)  1 + alpha^2*||c||^2, f32 (constant, single-buffered)
    # w_ref:    (Cp, tn)  weights tile for output-column block j
    # o_ref:    (tm, tn)  output tile
    # basis_ref:(tm, Cp)  VMEM scratch — basis reused across all output tiles j
    j = pl.program_id(1)

    # Basis depends only on the batch tile: compute once per batch tile (j==0).
    @pl.when(j == 0)
    def _():
        x = x_ref[...]
        # Elementwise norm path in f32 (v5e has no bf16 VPU/EUP).
        x_f32 = x.astype(jnp.float32)
        x_sq = alpha_sq * jnp.sum(x_f32 * x_f32, axis=-1, keepdims=True)  # (tm, 1)
        # MXU in native dtype, f32 accumulation. ct is pre-scaled by -2*alpha^2,
        # so xc already carries the full cross term.
        xc = jnp.dot(x, ct_ref[...], preferred_element_type=jnp.float32)  # (tm, Cp)
        # t = 1 + alpha^2 * ||x - c||^2, clamped at 1 to guard f32 cancellation.
        t = jnp.maximum(csq1_ref[...] + x_sq + xc, 1.0)
        basis_ref[...] = jnp.sqrt(t).astype(basis_ref.dtype)

    # output tile = basis @ weights[:, j*tn:(j+1)*tn]
    o_ref[...] = jnp.dot(basis_ref[...], w_ref[...],
                         preferred_element_type=jnp.float32).astype(o_ref.dtype)


def rbf_kan_forward(x, centers, weights, alpha=1.0, *, tm=None):
    B, D = x.shape
    C, D2 = centers.shape
    assert D == D2
    C2, O = weights.shape
    assert C == C2

    compute_dtype = x.dtype
    alpha = float(alpha)
    a2 = alpha * alpha

    # Padding: lane axes (centers C, outputs O) to 128, contraction D to 8.
    Dp = _round_up(D, 8)
    Cp = _round_up(C, 128)
    Op = _round_up(O, 128)
    # Output-column tile: 256 feeds the 256-wide MXUs of v6e/v7x; else 128.
    tn = 256 if Op % 256 == 0 else 128

    # Batch tile: large for MXU/pipeline efficiency, but >=2 grid steps when B
    # allows so v7x's second TensorCore is used.
    if tm is None:
        tm = min(512, _round_up(max((B + 1) // 2, 1), 8))
    tm = max(8, _round_up(int(tm), 8))

    budget = _vmem_budget_bytes()
    isz = jnp.dtype(compute_dtype).itemsize
    osz = jnp.dtype(x.dtype).itemsize

    def vmem_needed(tm_):
        return (
            2 * tm_ * Dp * isz        # x tile (double-buffered over i)
            + Dp * Cp * isz           # centers^T (single-buffered, constant)
            + 8 * Cp * 4              # csq1 (sublane-padded, single-buffered)
            + 2 * Cp * tn * isz       # weights tile (double-buffered over j)
            + 2 * tm_ * tn * osz      # output tile (double-buffered)
            + tm_ * Cp * isz          # basis scratch
            + 3 * tm_ * Cp * 4        # in-kernel f32 temporaries (xc / t / sqrt)
            + (2 << 20)               # headroom
        )

    # Shrink the batch tile if the footprint would exceed this chip's VMEM.
    while tm > 8 and vmem_needed(tm) > budget:
        tm = max(8, _round_up(tm // 2, 8))

    Bp = _round_up(B, tm)
    vmem_limit = int(min(max(vmem_needed(tm), 32 << 20), budget))

    # --- one-time wrapper-side prep (outside the grid loop) ---
    x_p = jnp.pad(x, ((0, Bp - B), (0, Dp - D)))
    # Pre-scaled, pre-transposed centers: (-2*alpha^2) * centers^T, zero-padded.
    ct = jnp.pad((-2.0 * a2) * centers.astype(jnp.float32).T,
                 ((0, Dp - D), (0, Cp - C))).astype(compute_dtype)
    # 1 + alpha^2 * ||c||^2 (f32); padded centers get 1.0 (their weights are 0).
    csq1 = 1.0 + a2 * jnp.sum(centers.astype(jnp.float32) ** 2, axis=-1)
    csq1 = jnp.pad(csq1, (0, Cp - C), constant_values=1.0).reshape(1, Cp)
    # Weights: zero rows for padded centers, zero cols for padded outputs.
    w_p = jnp.pad(weights.astype(compute_dtype), ((0, Cp - C), (0, Op - O)))

    kernel = functools.partial(rbf_kan_kernel, alpha_sq=a2)
    out_p = pl.pallas_call(
        kernel,
        out_shape=jax.ShapeDtypeStruct((Bp, Op), x.dtype),
        grid_spec=pltpu.PrefetchScalarGridSpec(
            num_scalar_prefetch=0,
            grid=(Bp // tm, Op // tn),
            in_specs=[
                pl.BlockSpec((tm, Dp), lambda i, j: (i, 0)),      # x batch tile
                pl.BlockSpec((Dp, Cp), lambda i, j: (0, 0),       # centers^T
                             pipeline_mode=pl.Buffered(1)),
                pl.BlockSpec((1, Cp), lambda i, j: (0, 0),        # 1+a^2||c||^2
                             pipeline_mode=pl.Buffered(1)),
                pl.BlockSpec((Cp, tn), lambda i, j: (0, j)),      # weights tile
            ],
            out_specs=pl.BlockSpec((tm, tn), lambda i, j: (i, j)),
            scratch_shapes=[pltpu.VMEM((tm, Cp), compute_dtype)],  # basis
        ),
        compiler_params=pltpu.CompilerParams(
            dimension_semantics=("parallel", "arbitrary"),
            vmem_limit_bytes=vmem_limit),
    )(x_p, ct, csq1, w_p)

    return out_p[:B, :O]


def xavier_uniform(key, shape, dtype=jnp.float32):
    # PyTorch xavier_uniform_ on a 2-D (fan_out, fan_in) tensor.
    fan_out, fan_in = shape
    bound = (6.0 / (fan_in + fan_out)) ** 0.5
    return jax.random.uniform(key, shape, dtype, minval=-bound, maxval=bound)


if __name__ == "__main__":
    # Small shapes consistent with the module's forward.
    batch, input_dim, output_dim, num_centers = 8, 16, 32, 24
    alpha = 1.0

    key = jax.random.PRNGKey(0)
    k_x, k_c, k_w = jax.random.split(key, 3)

    x = jax.random.normal(k_x, (batch, input_dim), jnp.float32)
    centers = xavier_uniform(k_c, (num_centers, input_dim))
    weights = xavier_uniform(k_w, (num_centers, output_dim))

    out = rbf_kan_forward(x, centers, weights, alpha)
    out = jax.block_until_ready(out)

    # Pure-JAX reference (mirrors the PyTorch forward exactly).
    d = jnp.sqrt(jnp.maximum(
        jnp.sum((x[:, None, :] - centers[None, :, :]) ** 2, axis=-1), 0.0))
    basis = jnp.sqrt(1.0 + (alpha * d) ** 2)
    ref = jnp.sum(basis[:, :, None] * weights[None, :, :], axis=1)

    assert out.shape == (batch, output_dim)
    assert jnp.allclose(out, ref, atol=1e-4, rtol=1e-4)
    print("KERNEL_OK")
</pallas_src>

<mosaic_0001>
module attributes {stable_mosaic.version = 11 : i64} {
  func.func @rbf_kan_kernel(%arg0: i32, %arg1: i32, %arg2: memref<8x16xf32, #tpu.memory_space<vmem>>, %arg3: memref<16x128xf32, #tpu.memory_space<vmem>>, %arg4: memref<1x128xf32, #tpu.memory_space<vmem>>, %arg5: memref<128x128xf32, #tpu.memory_space<vmem>>, %arg6: memref<8x128xf32, #tpu.memory_space<vmem>>, %arg7: memref<8x128xf32, #tpu.memory_space<vmem>>) attributes {dimension_semantics = [#tpu.dimension_semantics<parallel>, #tpu.dimension_semantics<arbitrary>], iteration_bounds = array<i64: 1, 1>, scalar_prefetch = 0 : i64, scratch_operands = 1 : i64, tpu.core_type = #tpu.core_type<tc>, window_params = [{transform_indices = @transform_0, window_bounds = array<i64: 8, 16>}, {pipeline_mode = #tpu.pipeline_mode<synchronous>, transform_indices = @transform_1, window_bounds = array<i64: 16, 128>}, {pipeline_mode = #tpu.pipeline_mode<synchronous>, transform_indices = @transform_2, window_bounds = array<i64: 1, 128>}, {transform_indices = @transform_3, window_bounds = array<i64: 128, 128>}, {transform_indices = @transform_4, window_bounds = array<i64: 8, 128>}]} {
    %c0_i32 = arith.constant 0 : i32
    %0 = arith.cmpi eq, %arg1, %c0_i32 : i32
    %1 = arith.extui %0 : i1 to i32
    %c0_i32_0 = arith.constant 0 : i32
    %2 = arith.cmpi ne, %1, %c0_i32_0 : i32
    scf.if %2 {
      %c0_6 = arith.constant 0 : index
      %c0_7 = arith.constant 0 : index
      %7 = vector.load %arg2[%c0_6, %c0_7] : memref<8x16xf32, #tpu.memory_space<vmem>>, vector<8x16xf32>
      %8 = arith.mulf %7, %7 : vector<8x16xf32>
      %cst_8 = arith.constant dense<0.000000e+00> : vector<8xf32>
      %9 = vector.multi_reduction <add>, %8, %cst_8 [1] : vector<8x16xf32> to vector<8xf32>
      %10 = vector.shape_cast %9 : vector<8xf32> to vector<8x1xf32>
      %cst_9 = arith.constant 1.000000e+00 : f32
      %11 = vector.broadcast %cst_9 : f32 to vector<8x1xf32>
      %12 = arith.mulf %11, %10 : vector<8x1xf32>
      %c0_10 = arith.constant 0 : index
      %c0_11 = arith.constant 0 : index
      %13 = vector.load %arg3[%c0_10, %c0_11] : memref<16x128xf32, #tpu.memory_space<vmem>>, vector<16x128xf32>
      %cst_12 = arith.constant dense<0.000000e+00> : vector<8x128xf32>
      %14 = tpu.matmul %7, %13, %cst_12 {dimension_numbers = #tpu.dot_dimension_numbers<[1], [0], [0], [1], [0, 0, 1, 1], [], []>} : vector<8x16xf32>, vector<16x128xf32>, vector<8x128xf32> -> vector<8x128xf32>
      %c0_13 = arith.constant 0 : index
      %c0_14 = arith.constant 0 : index
      %15 = vector.load %arg4[%c0_13, %c0_14] : memref<1x128xf32, #tpu.memory_space<vmem>>, vector<1x128xf32>
      %16 = vector.broadcast %15 : vector<1x128xf32> to vector<8x128xf32>
      %17 = vector.broadcast %12 : vector<8x1xf32> to vector<8x128xf32>
      %18 = arith.addf %16, %17 : vector<8x128xf32>
      %19 = arith.addf %18, %14 : vector<8x128xf32>
      %cst_15 = arith.constant 1.000000e+00 : f32
      %20 = vector.broadcast %cst_15 : f32 to vector<8x128xf32>
      %21 = arith.maximumf %19, %20 : vector<8x128xf32>
      %22 = math.sqrt %21 : vector<8x128xf32>
      %c0_16 = arith.constant 0 : index
      %c0_17 = arith.constant 0 : index
      %23 = vector.load %arg7[%c0_16, %c0_17] : memref<8x128xf32, #tpu.memory_space<vmem>>, vector<8x128xf32>
      tpu.vector_store %arg7[%c0_16, %c0_17], %22 {strides = array<i32>} : memref<8x128xf32, #tpu.memory_space<vmem>>, vector<8x128xf32>,
    } else {
    }
    %c0 = arith.constant 0 : index
    %c0_1 = arith.constant 0 : index
    %3 = vector.load %arg7[%c0, %c0_1] : memref<8x128xf32, #tpu.memory_space<vmem>>, vector<8x128xf32>
    %c0_2 = arith.constant 0 : index
    %c0_3 = arith.constant 0 : index
    %4 = vector.load %arg5[%c0_2, %c0_3] : memref<128x128xf32, #tpu.memory_space<vmem>>, vector<128x128xf32>
    %cst = arith.constant dense<0.000000e+00> : vector<8x128xf32>
    %5 = tpu.matmul %3, %4, %cst {dimension_numbers = #tpu.dot_dimension_numbers<[1], [0], [0], [1], [0, 0, 1, 1], [], []>} : vector<8x128xf32>, vector<128x128xf32>, vector<8x128xf32> -> vector<8x128xf32>
    %c0_4 = arith.constant 0 : index
    %c0_5 = arith.constant 0 : index
    %6 = vector.load %arg6[%c0_4, %c0_5] : memref<8x128xf32, #tpu.memory_space<vmem>>, vector<8x128xf32>
    tpu.vector_store %arg6[%c0_4, %c0_5], %5 {strides = array<i32>} : memref<8x128xf32, #tpu.memory_space<vmem>>, vector<8x128xf32>,
    return
  }
  func.func @transform_0(%arg0: i32, %arg1: i32) -> (i32, i32) {
    %c0_i32 = arith.constant 0 : i32
    %c0_i32_0 = arith.constant 0 : i32
    return %arg0, %c0_i32 : i32, i32
  }
  func.func @transform_1(%arg0: i32, %arg1: i32) -> (i32, i32) {
    %c0_i32 = arith.constant 0 : i32
    %c0_i32_0 = arith.constant 0 : i32
    %c0_i32_1 = arith.constant 0 : i32
    return %c0_i32, %c0_i32_0 : i32, i32
  }
  func.func @transform_2(%arg0: i32, %arg1: i32) -> (i32, i32) {
    %c0_i32 = arith.constant 0 : i32
    %c0_i32_0 = arith.constant 0 : i32
    %c0_i32_1 = arith.constant 0 : i32
    return %c0_i32, %c0_i32_0 : i32, i32
  }
  func.func @transform_3(%arg0: i32, %arg1: i32) -> (i32, i32) {
    %c0_i32 = arith.constant 0 : i32
    %c0_i32_0 = arith.constant 0 : i32
    return %c0_i32, %arg1 : i32, i32
  }
  func.func @transform_4(%arg0: i32, %arg1: i32) -> (i32, i32) {
    %c0_i32 = arith.constant 0 : i32
    return %arg0, %arg1 : i32, i32
  }
}

</mosaic_0001>

<bundles_post_ra>
// kernel: tpu_custom_call.1
= control target key start
LH: loop header
LB: loop body
LE: loop exit
PB: predicated region body
PF: predicated region fallthrough
CT: control target
= control target key end

     0   :  { %9 = vsyncpa [#allocation4], 0  ;;  %s472_s0 = inlined_call_operand.hbm [shape: f32[8,16], index: 0, kind: input, shape index: {}]   ;;  %s473_s1 = inlined_call_operand.hbm [shape: f32[16,128], index: 1, kind: input, shape index: {}]   ;;  %s474_s2 = inlined_call_operand.vmem [shape: f32[1,128], index: 2, kind: input, shape index: {}]   ;;  %s475_s3 = inlined_call_operand.hbm [shape: f32[128,128], index: 3, kind: input, shape index: {}]   ;;  %s476_s4 = inlined_call_operand.hbm [shape: f32[8,128], index: 4, kind: output, shape index: {}]  }
   0x1   :  { %10 = vsyncpa [#allocation7], 0 }
   0x2   :  { %11 = vsyncpa [#allocation5], 0  ;;  %s424_s15 = smov [#allocation6]  }
   0x3   :  { %s27_s16 = sshll.u32 %s424_s15, 4  ;;  %s28_s16 = int_to_ptr.vmem [resolvable:$true] %s27_s16 }
   0x4   :  { %s346_s17 = scalar_lea.vmem %s28_s16, 256  ;;  %p351_p1 = scmp.lt.s32.totalorder %s28_s16, %s28_s16 }
   0x5   :  { %p347_p0 = scmp.ne.s32.totalorder %s28_s16, %s346_s17  ;;  %p352_p2 = scmp.lt.s32.totalorder %s346_s17, %s346_s17 }
   0x7   :  { %p353_p3 = por %p352_p2, %p351_p1 }
   0x9   :  { %p354_p4 = pnand %p353_p3, %p347_p0 }
   0xb   :  { %357 = shalt.err (!%p354_p4)
}
   0xc   :  { %s425_s18 = smov 128   ;;  %s426_s19 = smov 8  }
   0xd   :  { %33 = dma.hbm_to_vmem [thread:$0]  %s473_s1, 256, %s28_s16, [#allocation7], %s425_s18, %s425_s18, %s426_s19  }
   0xe   :  { %s427_s22 = smov [#allocation3]   ;;  %s428_s24 = smov [#allocation8]  }
   0xf   :  { %s18_s23 = sshll.u32 %s427_s22, 4  ;;  %s41_s25 = sshll.u32 %s428_s24, 4  ;;  %s19_s23 = int_to_ptr.vmem [resolvable:$true] %s18_s23  ;;  %s42_s25 = int_to_ptr.vmem [resolvable:$true] %s41_s25 }
  0x10   :  { %s366_s26 = scalar_lea.vmem %s19_s23, 128  ;;  %p371_p6 = scmp.lt.s32.totalorder %s19_s23, %s19_s23 }
  0x11   :  { %p367_p5 = scmp.ne.s32.totalorder %s19_s23, %s366_s26  ;;  %p372_p7 = scmp.lt.s32.totalorder %s366_s26, %s366_s26 }
  0x13   :  { %p373_p8 = por %p372_p7, %p371_p6 }
  0x15   :  { %p374_p9 = pnand %p373_p8, %p367_p5 }
  0x17   :  { %377 = shalt.err (!%p374_p9)
}
  0x18   :  { %21 = dma.hbm_to_vmem [thread:$0]  %s472_s0, 128, %s19_s23, [#allocation4]  }
  0x19   :  { %s386_s29 = scalar_lea.vmem %s42_s25, 2048  ;;  %p391_p11 = scmp.lt.s32.totalorder %s42_s25, %s42_s25 }
  0x1a   :  { %p387_p10 = scmp.ne.s32.totalorder %s42_s25, %s386_s29  ;;  %p392_p12 = scmp.lt.s32.totalorder %s386_s29, %s386_s29 }
  0x1c   :  { %p393_p13 = por %p392_p12, %p391_p11 }
  0x1e   :  { %p394_p0 = pnand %p393_p13, %p387_p10 }
  0x20   :  { %397 = shalt.err (!%p394_p0)
}
  0x21   :  { %47 = dma.hbm_to_vmem [thread:$0]  %s475_s3, 2048, %s42_s25, [#allocation7], %s425_s18, %s425_s18, %s426_s19  }
  0x22   :  { %418 = dma.done.wait [#allocation4], 128  }
  0x23   :  { %419 = vsyncadd [#allocation4], 4294967168 }
  0x24   :  { %420 = dma.done.wait [#allocation7], 2304  }
  0x25   :  { %421 = vsyncadd [#allocation7], 4294964992  ;;  %v429_v0 = vmov 0.0   ;;  %vm430_vm0 = vmmov 0   ;;  %v68_v1 = vld [vmem:[#allocation6 + $0x8] sm:$0xff]  ;;  %v67_v2 = vld [vmem:[#allocation6] sm:$0xff] }
  0x26   :  { %286 = vmatprep.subr.mxu0 %v429_v0  ;;  %290 = vmatprep.mubr.msk.f32.mxu0 %vm430_vm0, %v429_v0  ;;  %v61_v3 = vld [vmem:[#allocation3] sm:$0xff]  ;;  %vm63_vm1 = vcmask 130048   ;;  %v176_v5 = vld [vmem:[#allocation8 + $0x78] sm:$0xff]  ;;  %v175_v6 = vld [vmem:[#allocation8 + $0x70] sm:$0xff]  ;;  %s431_s5 = smov [#allocation9]  }
  0x27   :  { %293 = vmatprep.subr.mxu1 %v429_v0  ;;  %325 = vmatprep.mubr.msk.f32.mxu1 %vm430_vm0, %v429_v0  ;;  %v62_v4 = vmul.f32 %v61_v3, %v61_v3  ;;  %v174_v8 = vld [vmem:[#allocation8 + $0x68] sm:$0xff]  ;;  %v173_v9 = vld [vmem:[#allocation8 + $0x60] sm:$0xff]  ;;  %v172_v10 = vld [vmem:[#allocation8 + $0x58] sm:$0xff]  ;;  %s254_s6 = sshll.u32 %s431_s5, 4  ;;  %s255_s6 = int_to_ptr.vmem [resolvable:$true] %s254_s6 }
  0x28   :  { %287 = vmatpush3.msra.mxu0 %v68_v1  ;;  %294 = vmatpush3.msra.mxu1 %v176_v5  ;;  %v171_v11 = vld [vmem:[#allocation8 + $0x50] sm:$0xff]  ;;  %v170_v12 = vld [vmem:[#allocation8 + $0x48] sm:$0xff]  ;;  %v169_v13 = vld [vmem:[#allocation8 + $0x40] sm:$0xff]  ;;  %p403_p2 = scmp.lt.s32.totalorder %s255_s6, %s255_s6 }
  0x29   :  { %288 = vmatprep.subr.mxu0 %v429_v0  ;;  %v64_v7 = vsel %vm63_vm1, %v62_v4, 0.0  ;;  %295 = vmatprep.subr.mxu1 %v429_v0  ;;  %v168_v14 = vld [vmem:[#allocation8 + $0x38] sm:$0xff]  ;;  %v167_v15 = vld [vmem:[#allocation8 + $0x30] sm:$0xff]  ;;  %v166_v16 = vld [vmem:[#allocation8 + $0x28] sm:$0xff] }
  0x2a   :  { %289 = vmatpush3.msra.mxu0 %v67_v2  ;;  %65 = vadd.xlane.f32.xlu0 %v64_v7  ;;  %v165_v17 = vld [vmem:[#allocation8 + $0x20] sm:$0xff]  ;;  %v164_v18 = vld [vmem:[#allocation8 + $0x18] sm:$0xff]  ;;  %v163_v19 = vld [vmem:[#allocation8 + $0x10] sm:$0xff] }
  0x2b   :  { %291 = vmatmul.mubr.msk.f32.vlgmr.msra.gmra.mxu0 %vm63_vm1, %v61_v3  ;;  %296 = vmatpush3.msra.mxu1 %v175_v6  ;;  %v162_v20 = vld [vmem:[#allocation8 + $0x8] sm:$0xff]  ;;  %v161_v21 = vld [vmem:[#allocation8] sm:$0xff] }
  0x2c   :  { %297 = vmatprep.subr.mxu1 %v429_v0  ;;  %v265_v23 = vld [vmem:[%s474_s2] ss:$0 sm:$0xff]  ;;  %s398_s2 = scalar_lea.vmem %s255_s6, 128 }
  0x2d   :  { %298 = vmatpush3.msra.mxu1 %v174_v8  ;;  %p399_p1 = scmp.ne.s32.totalorder %s255_s6, %s398_s2  ;;  %p404_p3 = scmp.lt.s32.totalorder %s398_s2, %s398_s2 }
  0x2e   :  { %299 = vmatprep.subr.mxu1 %v429_v0 }
  0x2f   :  { %300 = vmatpush3.msra.mxu1 %v173_v9  ;;  %p405_p4 = por %p404_p3, %p403_p2 }
  0x30   :  { %301 = vmatprep.subr.mxu1 %v429_v0 }
  0x31   :  { %302 = vmatpush3.msra.mxu1 %v172_v10  ;;  %p406_p5 = pnand %p405_p4, %p399_p1 }
  0x32   :  { %303 = vmatprep.subr.mxu1 %v429_v0 }
  0x33   :  { %304 = vmatpush3.msra.mxu1 %v171_v11 }
  0x34   :  { %305 = vmatprep.subr.mxu1 %v429_v0 }
  0x35   :  { %306 = vmatpush3.msra.mxu1 %v170_v12 }
  0x36   :  { %307 = vmatprep.subr.mxu1 %v429_v0 }
  0x37   :  { %308 = vmatpush3.msra.mxu1 %v169_v13 }
  0x38   :  { %309 = vmatprep.subr.mxu1 %v429_v0 }
  0x39   :  { %310 = vmatpush3.msra.mxu1 %v168_v14 }
  0x3a   :  { %311 = vmatprep.subr.mxu1 %v429_v0 }
  0x3b   :  { %312 = vmatpush3.msra.mxu1 %v167_v15 }
  0x3c   :  { %313 = vmatprep.subr.mxu1 %v429_v0 }
  0x3d   :  { %314 = vmatpush3.msra.mxu1 %v166_v16 }
  0x3e   :  { %315 = vmatprep.subr.mxu1 %v429_v0 }
  0x3f   :  { %316 = vmatpush3.msra.mxu1 %v165_v17 }
  0x40   :  { %317 = vmatprep.subr.mxu1 %v429_v0 }
  0x41   :  { %318 = vmatpush3.msra.mxu1 %v164_v18 }
  0x42   :  { %319 = vmatprep.subr.mxu1 %v429_v0 }
  0x43   :  { %320 = vmatpush3.msra.mxu1 %v163_v19 }
  0x44   :  { %321 = vmatprep.subr.mxu1 %v429_v0 }
  0x45   :  { %322 = vmatpush3.msra.mxu1 %v162_v20 }
  0x46   :  { %323 = vmatprep.subr.mxu1 %v429_v0 }
  0x47   :  { %324 = vmatpush3.msra.mxu1 %v161_v21 }
  0xb3   :  { %v66_v22 = vpop.xlane.xlu0 %65 }
  0xb4   :  { %v149_v24 = vadd.f32 %v265_v23, %v66_v22 }
  0xeb   :  { %v138_v25 = vpop.f32.mrf.mxu0 }
  0xec   :  { %v150_v26 = vadd.f32 %v149_v24, %v138_v25 }
  0xed   :  { %v292_v27 = vpop.f32.mrf.mxu0 }
  0xee   :  { %v151_v28 = vmax.f32 %v150_v26, 1.0 }
  0xf0   :  { %336 = vrsqrt.f32 %v151_v28  ;;  %vm154_vm2 = vcmp.eq.f32.partialorder %v151_v28, inf  ;;  %v157_v31 = vand.u32 2147483648, %v151_v28  ;;  %vm156_vm3 = vcmp.eq.f32.partialorder %v151_v28, 0.0 }
  0xfd   :  { %v337_v29 = vpop.eup %336 }
  0xfe   :  { %v153_v30 = vmul.f32 %v337_v29, %v151_v28 }
 0x100   :  { %v155_v32 = vsel %vm154_vm2, %v151_v28, %v153_v30 }
 0x101   :  { %v158_v33 = vsel %vm156_vm3, %v157_v31, %v155_v32 }
 0x102   :  { %326 = vmatmul.mubr.f32.vlgmr.msra.gmra.mxu1 %v158_v33 }
 0x1c2   :  { %v243_v34 = vpop.f32.mrf.mxu1 }
 0x1c3   :  { %247 = vst [vmem:[#allocation9] sm:$0xff] %v243_v34 }
 0x1c4   :  { %v327_v35 = vpop.f32.mrf.mxu1 }
 0x1c5   :  { %409 = shalt.err (!%p406_p5)
}
 0x1c6   :  { %257 = dma.vmem_to_hbm [thread:$0]  %s255_s6, 128, %s476_s4, [#allocation5]  }
 0x1c7   :  { %422 = dma.done.wait [#allocation5], 128  }
 0x1c8   :  { %423 = vsyncadd [#allocation5], 4294967168 }
 0x1c9   :  { %261 = vsyncpa [#allocation4], 1 }
 0x1ca   :  { %262 = vsyncpa [#allocation7], 1 }
 0x1cb   :  { %263 = vsyncpa [#allocation5], 1 }

</bundles_post_ra>
